<compile_context>
chip_gen: v6e
topology: v6e:2x2x1
jax: 0.10.0
libtpu: 0.0.40
codegen_flags: <defaults>
</compile_context>

<pallas_src>
import jax
import jax.numpy as jnp
from jax.experimental import pallas as pl
from jax.experimental.pallas import tpu as pltpu


def _round_up(x, m):
    return ((x + m - 1) // m) * m


# ---------------------------------------------------------------------------
# Kernels
# ---------------------------------------------------------------------------
def _att_body(x_ref, mask_ref, w_ref, b_ref, qt_ref, o_ref):
    tb, s, d = x_ref.shape

    x2 = x_ref[...].reshape(tb * s, d)                       # no-op: s % sublane == 0

    # Projection on the MXU (bf16 or f32 operands, f32 accumulate) + EUP tanh.
    att = jnp.tanh(
        jnp.dot(x2, w_ref[...], preferred_element_type=jnp.float32)
        + b_ref[...].astype(jnp.float32)
    )                                                        # (TB*S, dim) f32

    # score = att @ q done as a lane reduce (an N=1 MXU matmul wastes lanes).
    score = jnp.sum(att * qt_ref[...].astype(jnp.float32), axis=-1, keepdims=True)

    # exp without max-subtraction, matching torch.exp in the reference module.
    e = jnp.exp(score)                                       # (TB*S, 1)
    if mask_ref is not None:
        e = e * mask_ref[...].astype(jnp.float32).reshape(tb * s, 1)

    e3 = e.reshape(tb, s, 1)
    denom = jnp.sum(e3, axis=1, keepdims=True) + 1e-08       # (TB, 1, 1)
    inv = pl.reciprocal(denom, approx=False)                 # exact divide
    weight = (e3 * inv).reshape(tb * s, 1)                   # (TB*S, 1)

    # Weighted sum over sequence: lane-splat multiply + sublane-group reduce.
    weighted = x2.astype(jnp.float32) * weight               # (TB*S, D) f32
    out = jnp.sum(weighted.reshape(tb, s, d), axis=1)        # (TB, D)
    o_ref[...] = out.astype(o_ref.dtype)


def _att_kernel(x_ref, w_ref, b_ref, qt_ref, o_ref):
    _att_body(x_ref, None, w_ref, b_ref, qt_ref, o_ref)


def _att_kernel_masked(x_ref, mask_ref, w_ref, b_ref, qt_ref, o_ref):
    _att_body(x_ref, mask_ref, w_ref, b_ref, qt_ref, o_ref)


# ---------------------------------------------------------------------------
# Tile-size / VMEM budgeting
# ---------------------------------------------------------------------------
def _vmem_capacity_bytes():
    try:
        cap = int(getattr(pltpu.get_tpu_info(), "vmem_capacity_bytes", 0))
        if cap > 0:
            return cap
    except Exception:
        pass
    return 64 * 1024 * 1024          # conservative fallback: v7x per-TC VMEM


def _pick_tb(B, s_pad, d_pad, dim, itemsize, use_mask):
    """Batch-tile rows per grid step, from the FULL per-step VMEM footprint."""
    vmem_cap = _vmem_capacity_bytes()
    budget = vmem_cap // 2                                   # compiler headroom
    vmem_limit = min(int(vmem_cap * 0.75), 96 * 1024 * 1024)

    per_row = (
        2 * s_pad * d_pad * itemsize                         # x block, 2 buffers
        + (2 * s_pad * 4 if use_mask else 0)                 # mask block, 2 buffers
        + 2 * d_pad * itemsize                               # out block, 2 buffers
        + s_pad * dim * 4                                    # att intermediate (f32)
        + s_pad * d_pad * 4                                  # weighted temp (f32)
        + (s_pad * d_pad * 4 if itemsize < 4 else 0)         # f32 upcast of x2
        + 8 * s_pad * 4                                      # 1-lane temps (slop)
    )
    fixed = 2 * d_pad * dim * itemsize + 8 * dim * 4 + (1 << 20)

    tb = (budget - fixed) // max(1, per_row)
    tb = max(8, min(1024, (tb // 8) * 8))
    if B > 8:
        # Keep >= 2 grid steps so both v7x TensorCores get work (no-op on v5e/v6e).
        tb = min(tb, max(8, _round_up((B + 1) // 2, 8)))
    tb = min(tb, _round_up(B, 8))
    return tb, vmem_limit


# ---------------------------------------------------------------------------
# Wrapper
# ---------------------------------------------------------------------------
def att_layer2(inputs, W, b, q, mask=None):
    """Soft alignment attention (AttLayer2.forward).

    inputs: (B, S, D_in) f32 or bf16 (pass bf16 to halve HBM traffic).
    W: (D_in, dim); b: (dim,); q: (dim, 1); mask: optional (B, S).
    Returns (B, D_in) in inputs.dtype.
    """
    B, S, d_in = inputs.shape
    dim = W.shape[1]
    x_dtype = inputs.dtype
    itemsize = jnp.dtype(x_dtype).itemsize

    # Parameters: W streamed in the matmul dtype; b/q stay f32 (f32 math path).
    w2 = W.astype(x_dtype)
    b2 = b.reshape(1, dim).astype(jnp.float32)
    qt = q.reshape(1, dim).astype(jnp.float32)

    # --- padding -------------------------------------------------------------
    sub = 16 if itemsize == 2 else 8                  # sublane multiple for x dtype
    s_pad = _round_up(S, sub)

    d_pad = d_in
    if d_in % 128 != 0:
        cand = _round_up(d_in, 128)
        if cand * 8 <= d_in * 9:                      # <= 12.5% extra read traffic
            d_pad = cand

    use_mask = (mask is not None) or (s_pad != S)
    tb, vmem_limit = _pick_tb(B, s_pad, d_pad, dim, itemsize, use_mask)
    num_tiles = (B + tb - 1) // tb
    b_pad = num_tiles * tb

    x = inputs
    if (b_pad, s_pad, d_pad) != (B, S, d_in):
        x = jnp.pad(x, ((0, b_pad - B), (0, s_pad - S), (0, d_pad - d_in)))
    if d_pad != d_in:
        w2 = jnp.pad(w2, ((0, d_pad - d_in), (0, 0)))

    m = None
    if use_mask:
        m = jnp.ones((B, S), jnp.float32) if mask is None else mask.astype(jnp.float32)
        m = m.reshape(B, S, 1)
        if (b_pad, s_pad) != (B, S):
            m = jnp.pad(m, ((0, b_pad - B), (0, s_pad - S), (0, 0)))

    # --- specs ---------------------------------------------------------------
    x_spec = pl.BlockSpec((tb, s_pad, d_pad), lambda i: (i, 0, 0))
    w_spec = pl.BlockSpec((d_pad, dim), lambda i: (0, 0))
    b_spec = pl.BlockSpec((1, dim), lambda i: (0, 0))
    q_spec = pl.BlockSpec((1, dim), lambda i: (0, 0))
    out_spec = pl.BlockSpec((tb, d_pad), lambda i: (i, 0))

    if m is None:
        kernel = _att_kernel
        in_specs = [x_spec, w_spec, b_spec, q_spec]
        args = (x, w2, b2, qt)
    else:
        kernel = _att_kernel_masked
        m_spec = pl.BlockSpec((tb, s_pad, 1), lambda i: (i, 0, 0))
        in_specs = [x_spec, m_spec, w_spec, b_spec, q_spec]
        args = (x, m, w2, b2, qt)

    cost = pl.CostEstimate(
        flops=2 * B * S * d_in * dim + 2 * B * S * dim + 2 * B * S * d_in,
        transcendentals=B * S * dim + B * S,
        bytes_accessed=(x.size * itemsize + w2.size * itemsize
                        + (m.size * 4 if m is not None else 0)
                        + b_pad * d_pad * itemsize),
    )

    out = pl.pallas_call(
        kernel,
        out_shape=jax.ShapeDtypeStruct((b_pad, d_pad), x_dtype),
        grid_spec=pltpu.PrefetchScalarGridSpec(
            num_scalar_prefetch=0,
            grid=(num_tiles,),
            in_specs=in_specs,
            out_specs=out_spec,
        ),
        compiler_params=pltpu.CompilerParams(
            dimension_semantics=("parallel",),        # megacore sharding on v7x
            vmem_limit_bytes=vmem_limit,
        ),
        cost_estimate=cost,
    )(*args)

    return out[:B, :d_in]


# ---------------------------------------------------------------------------
# Reference + test
# ---------------------------------------------------------------------------
def _xavier_uniform(key, shape, dtype=jnp.float32):
    fan_in, fan_out = shape[0], shape[1]
    limit = (6.0 / (fan_in + fan_out)) ** 0.5
    return jax.random.uniform(key, shape, dtype, minval=-limit, maxval=limit)


def _reference(inputs, W, b, q, mask=None):
    att = jnp.tanh(jnp.matmul(inputs, W) + b)
    att = jnp.matmul(att, q)[..., 0]
    att = jnp.exp(att)
    if mask is not None:
        att = att * mask
    w = att / (jnp.sum(att, axis=-1, keepdims=True) + 1e-08)
    return jnp.sum(inputs * w[..., None], axis=1)


if __name__ == "__main__":
    B, S, D_IN, DIM = 2, 8, 32, 16

    key = jax.random.PRNGKey(0)
    k_x, k_w, k_q, k_m, k_x2 = jax.random.split(key, 5)

    inputs = jax.random.normal(k_x, (B, S, D_IN), dtype=jnp.float32)
    W = _xavier_uniform(k_w, (D_IN, DIM))
    b = jnp.zeros((DIM,), dtype=jnp.float32)
    q = _xavier_uniform(k_q, (DIM, 1))

    # f32, mask=None
    out = jax.block_until_ready(att_layer2(inputs, W, b, q))
    ref = _reference(inputs, W, b, q)
    assert out.shape == (B, D_IN)
    assert jnp.allclose(out, ref, atol=1e-4, rtol=1e-4), "mismatch vs reference (f32, no mask)"

    # f32, masked path (exp(score) * mask)
    mask = (jax.random.uniform(k_m, (B, S)) > 0.3).astype(jnp.float32)
    mask = mask.at[:, 0].set(1.0)            # keep >=1 valid position per row
    out_m = jax.block_until_ready(att_layer2(inputs, W, b, q, mask=mask))
    ref_m = _reference(inputs, W, b, q, mask)
    assert jnp.allclose(out_m, ref_m, atol=1e-4, rtol=1e-4), "mismatch vs reference (f32, mask)"

    # bf16 streaming path (halves HBM traffic); odd S exercises sublane padding.
    S2, B2 = 7, 4
    x_bf = jax.random.normal(k_x2, (B2, S2, D_IN), dtype=jnp.float32).astype(jnp.bfloat16)
    out_bf = jax.block_until_ready(att_layer2(x_bf, W, b, q))
    ref_bf = _reference(x_bf.astype(jnp.float32), W, b, q)
    assert out_bf.shape == (B2, D_IN)
    assert jnp.allclose(out_bf.astype(jnp.float32), ref_bf, atol=5e-2, rtol=5e-2), \
        "mismatch vs reference (bf16)"

    print("KERNEL_OK")
</pallas_src>

<mosaic_0001>
module attributes {stable_mosaic.version = 11 : i64} {
  func.func @_att_kernel(%arg0: i32, %arg1: memref<8x8x32xf32, #tpu.memory_space<vmem>>, %arg2: memref<32x16xf32, #tpu.memory_space<vmem>>, %arg3: memref<1x16xf32, #tpu.memory_space<vmem>>, %arg4: memref<1x16xf32, #tpu.memory_space<vmem>>, %arg5: memref<8x32xf32, #tpu.memory_space<vmem>>) attributes {dimension_semantics = [#tpu.dimension_semantics<parallel>], iteration_bounds = array<i64: 1>, scalar_prefetch = 0 : i64, scratch_operands = 0 : i64, tpu.core_type = #tpu.core_type<tc>, window_params = [{transform_indices = @transform_0, window_bounds = array<i64: 8, 8, 32>}, {pipeline_mode = #tpu.pipeline_mode<synchronous>, transform_indices = @transform_1, window_bounds = array<i64: 32, 16>}, {pipeline_mode = #tpu.pipeline_mode<synchronous>, transform_indices = @transform_2, window_bounds = array<i64: 1, 16>}, {pipeline_mode = #tpu.pipeline_mode<synchronous>, transform_indices = @transform_3, window_bounds = array<i64: 1, 16>}, {transform_indices = @transform_4, window_bounds = array<i64: 8, 32>}]} {
    %c0 = arith.constant 0 : index
    %c0_0 = arith.constant 0 : index
    %c0_1 = arith.constant 0 : index
    %0 = vector.load %arg1[%c0, %c0_0, %c0_1] : memref<8x8x32xf32, #tpu.memory_space<vmem>>, vector<8x8x32xf32>
    %1 = vector.shape_cast %0 : vector<8x8x32xf32> to vector<64x32xf32>
    %c0_2 = arith.constant 0 : index
    %c0_3 = arith.constant 0 : index
    %2 = vector.load %arg2[%c0_2, %c0_3] : memref<32x16xf32, #tpu.memory_space<vmem>>, vector<32x16xf32>
    %cst = arith.constant dense<0.000000e+00> : vector<64x16xf32>
    %3 = tpu.matmul %1, %2, %cst {dimension_numbers = #tpu.dot_dimension_numbers<[1], [0], [0], [1], [0, 0, 1, 1], [], []>} : vector<64x32xf32>, vector<32x16xf32>, vector<64x16xf32> -> vector<64x16xf32>
    %c0_4 = arith.constant 0 : index
    %c0_5 = arith.constant 0 : index
    %4 = vector.load %arg3[%c0_4, %c0_5] : memref<1x16xf32, #tpu.memory_space<vmem>>, vector<1x16xf32>
    %5 = vector.broadcast %4 : vector<1x16xf32> to vector<64x16xf32>
    %6 = arith.addf %3, %5 : vector<64x16xf32>
    %7 = math.tanh %6 : vector<64x16xf32>
    %c0_6 = arith.constant 0 : index
    %c0_7 = arith.constant 0 : index
    %8 = vector.load %arg4[%c0_6, %c0_7] : memref<1x16xf32, #tpu.memory_space<vmem>>, vector<1x16xf32>
    %9 = vector.broadcast %8 : vector<1x16xf32> to vector<64x16xf32>
    %10 = arith.mulf %7, %9 : vector<64x16xf32>
    %cst_8 = arith.constant dense<0.000000e+00> : vector<64xf32>
    %11 = vector.multi_reduction <add>, %10, %cst_8 [1] : vector<64x16xf32> to vector<64xf32>
    %12 = vector.shape_cast %11 : vector<64xf32> to vector<64x1xf32>
    %13 = math.exp %12 : vector<64x1xf32>
    %14 = vector.shape_cast %13 : vector<64x1xf32> to vector<8x8x1xf32>
    %cst_9 = arith.constant dense<0.000000e+00> : vector<8x1xf32>
    %15 = vector.multi_reduction <add>, %14, %cst_9 [1] : vector<8x8x1xf32> to vector<8x1xf32>
    %16 = vector.shape_cast %15 : vector<8x1xf32> to vector<8x1x1xf32>
    %cst_10 = arith.constant 9.99999993E-9 : f32
    %17 = vector.broadcast %cst_10 : f32 to vector<8x1x1xf32>
    %18 = arith.addf %16, %17 : vector<8x1x1xf32>
    %19 = tpu.reciprocal %18 : vector<8x1x1xf32> -> vector<8x1x1xf32>
    %20 = vector.broadcast %19 : vector<8x1x1xf32> to vector<8x8x1xf32>
    %21 = arith.mulf %14, %20 : vector<8x8x1xf32>
    %22 = vector.shape_cast %21 : vector<8x8x1xf32> to vector<64x1xf32>
    %23 = vector.broadcast %22 : vector<64x1xf32> to vector<64x32xf32>
    %24 = arith.mulf %1, %23 : vector<64x32xf32>
    %25 = vector.shape_cast %24 : vector<64x32xf32> to vector<8x8x32xf32>
    %cst_11 = arith.constant dense<0.000000e+00> : vector<8x32xf32>
    %26 = vector.multi_reduction <add>, %25, %cst_11 [1] : vector<8x8x32xf32> to vector<8x32xf32>
    %c0_12 = arith.constant 0 : index
    %c0_13 = arith.constant 0 : index
    %27 = vector.load %arg5[%c0_12, %c0_13] : memref<8x32xf32, #tpu.memory_space<vmem>>, vector<8x32xf32>
    tpu.vector_store %arg5[%c0_12, %c0_13], %26 {strides = array<i32>} : memref<8x32xf32, #tpu.memory_space<vmem>>, vector<8x32xf32>,
    return
  }
  func.func @transform_0(%arg0: i32) -> (i32, i32, i32) {
    %c0_i32 = arith.constant 0 : i32
    %c0_i32_0 = arith.constant 0 : i32
    %c0_i32_1 = arith.constant 0 : i32
    return %arg0, %c0_i32, %c0_i32_0 : i32, i32, i32
  }
  func.func @transform_1(%arg0: i32) -> (i32, i32) {
    %c0_i32 = arith.constant 0 : i32
    %c0_i32_0 = arith.constant 0 : i32
    %c0_i32_1 = arith.constant 0 : i32
    return %c0_i32, %c0_i32_0 : i32, i32
  }
  func.func @transform_2(%arg0: i32) -> (i32, i32) {
    %c0_i32 = arith.constant 0 : i32
    %c0_i32_0 = arith.constant 0 : i32
    %c0_i32_1 = arith.constant 0 : i32
    return %c0_i32, %c0_i32_0 : i32, i32
  }
  func.func @transform_3(%arg0: i32) -> (i32, i32) {
    %c0_i32 = arith.constant 0 : i32
    %c0_i32_0 = arith.constant 0 : i32
    %c0_i32_1 = arith.constant 0 : i32
    return %c0_i32, %c0_i32_0 : i32, i32
  }
  func.func @transform_4(%arg0: i32) -> (i32, i32) {
    %c0_i32 = arith.constant 0 : i32
    %c0_i32_0 = arith.constant 0 : i32
    return %arg0, %c0_i32 : i32, i32
  }
}

</mosaic_0001>

<bundles_post_ra>
// kernel: tpu_custom_call.1
= control target key start
LH: loop header
LB: loop body
LE: loop exit
PB: predicated region body
PF: predicated region fallthrough
CT: control target
= control target key end

     0   :  { %9 = vsyncpa [#allocation3], 0  ;;  %s716_s0 = inlined_call_operand.hbm [shape: f32[8,8,32], index: 0, kind: input, shape index: {}]   ;;  %s717_s1 = inlined_call_operand.vmem [shape: f32[32,16], index: 1, kind: input, shape index: {}]   ;;  %s718_s2 = inlined_call_operand.vmem [shape: f32[1,16], index: 2, kind: input, shape index: {}]   ;;  %s719_s3 = inlined_call_operand.vmem [shape: f32[1,16], index: 3, kind: input, shape index: {}]   ;;  %s720_s4 = inlined_call_operand.hbm [shape: f32[8,32], index: 4, kind: output, shape index: {}]  }
   0x1   :  { %10 = vsyncpa [#allocation4], 0  ;;  %s566_s15 = smov [#allocation2]  }
   0x2   :  { %s16_s16 = sshll.u32 %s566_s15, 4  ;;  %s17_s16 = int_to_ptr.vmem [resolvable:$true] %s16_s16 }
   0x3   :  { %s530_s17 = scalar_lea.vmem %s17_s16, 1024  ;;  %p535_p1 = scmp.lt.s32.totalorder %s17_s16, %s17_s16 }
   0x4   :  { %p531_p0 = scmp.ne.s32.totalorder %s17_s16, %s530_s17  ;;  %p536_p2 = scmp.lt.s32.totalorder %s530_s17, %s530_s17 }
   0x6   :  { %p537_p3 = por %p536_p2, %p535_p1 }
   0x8   :  { %p538_p4 = pnand %p537_p3, %p531_p0 }
   0xa   :  { %541 = shalt.err (!%p538_p4)
}
   0xb   :  { %s567_s18 = smov 128   ;;  %s568_s19 = smov 8  }
   0xc   :  { %22 = dma.hbm_to_vmem [thread:$0]  %s716_s0, 1024, %s17_s16, [#allocation3], %s567_s18, %s567_s18, %s568_s19  }
   0xd   :  { %562 = dma.done.wait [#allocation3], 1024  }
   0xe   :  { %563 = vsyncadd [#allocation3], 4294966272  ;;  %v43_v0 = vld [vmem:[%s717_s1 + $0x18] sm:$0xff]  ;;  %v42_v1 = vld [vmem:[%s717_s1 + $0x10] sm:$0xff]  ;;  %vm51_vm0 = vcmask 261120   ;;  %vm204_vm1 = vcmask 130048  }
   0xf   :  { %442 = vmatprep.subr.mxu0 %v43_v0  ;;  %462 = vmatprep.subr.mxu1 %v43_v0  ;;  %v604_v2 = vld [vmem:[#allocation2] sm:$0xff]  ;;  %v41_v3 = vld [vmem:[%s717_s1 + $0x8] sm:$0xff]  ;;  %v616_v6 = vld [vmem:[#allocation2 + $0x10] sm:$0xff]  ;;  %vm389_vm2 = vcmask 1041409   ;;  %vm391_vm3 = vcmask 1042434   ;;  %vm393_vm4 = vcmask 1043459  }
  0x10   :  { %443 = vmatpush3.msra.mxu0 %v43_v0  ;;  %466 = vmatpush3.msra.mxu1 %v43_v0  ;;  %v40_v4 = vld [vmem:[%s717_s1] sm:$0xff]  ;;  %v614_v5 = vld [vmem:[#allocation2 + $0x8] sm:$0xff]  ;;  %v624_v9 = vld [vmem:[#allocation2 + $0x30] sm:$0xff]  ;;  %vm395_vm5 = vcmask 1044484   ;;  %vm397_vm6 = vcmask 1045509   ;;  %vm399_vm7 = vcmask 1046534  }
  0x11   :  { %444 = vmatprep.subr.mxu0 %v42_v1  ;;  %450 = vmatprep.mubr.msk.f32.mxu0 %vm51_vm0, %v604_v2  ;;  %v618_v7 = vld [vmem:[#allocation2 + $0x20] sm:$0xff]  ;;  %v620_v8 = vld [vmem:[#allocation2 + $0x28] sm:$0xff]  ;;  %v628_v10 = vld [vmem:[#allocation2 + $0x18] sm:$0xff]  ;;  %vm401_vm8 = vcmask 1047559  }
  0x12   :  { %445 = vmatpush3.msra.mxu0 %v42_v1  ;;  %463 = vmatprep.subr.mxu1 %v42_v1  ;;  %v636_v11 = vld [vmem:[#allocation2 + $0x38] sm:$0xff]  ;;  %v420_v12 = vld [vmem:[%s718_s2] ss:$0 sm:$0xff] }
  0x13   :  { %446 = vmatprep.subr.mxu0 %v41_v3  ;;  %467 = vmatpush3.msra.mxu1 %v42_v1  ;;  %v429_v29 = vld [vmem:[%s719_s3] ss:$0 sm:$0xff]  ;;  %s569_s3 = smov [#allocation5]  }
  0x14   :  { %447 = vmatpush3.msra.mxu0 %v41_v3  ;;  %464 = vmatprep.subr.mxu1 %v41_v3  ;;  %s411_s5 = sshll.u32 %s569_s3, 4  ;;  %s412_s5 = int_to_ptr.vmem [resolvable:$true] %s411_s5 }
  0x15   :  { %448 = vmatprep.subr.mxu0 %v40_v4  ;;  %468 = vmatpush3.msra.mxu1 %v41_v3  ;;  %s542_s6 = scalar_lea.vmem %s412_s5, 128  ;;  %p547_p6 = scmp.lt.s32.totalorder %s412_s5, %s412_s5 }
  0x16   :  { %449 = vmatpush3.msra.mxu0 %v40_v4  ;;  %465 = vmatprep.subr.mxu1 %v40_v4  ;;  %p543_p5 = scmp.ne.s32.totalorder %s412_s5, %s542_s6  ;;  %p548_p7 = scmp.lt.s32.totalorder %s542_s6, %s542_s6 }
  0x17   :  { %451 = vmatmul.mubr.msk.f32.vlgmr.msra.gmra.mxu0 %vm51_vm0, %v614_v5  ;;  %469 = vmatpush3.msra.mxu1 %v40_v4 }
  0x18   :  { %453 = vmatprep.mubr.msk.f32.mxu0 %vm51_vm0, %v616_v6  ;;  %456 = vmatprep.mubr.msk.f32.mxu1 %vm51_vm0, %v618_v7  ;;  %p549_p8 = por %p548_p7, %p547_p6 }
  0x19   :  { %457 = vmatmul.mubr.msk.f32.vlgmr.msra.gmra.mxu1 %vm51_vm0, %v620_v8 }
  0x1a   :  { %459 = vmatprep.mubr.msk.f32.mxu1 %vm51_vm0, %v624_v9  ;;  %p550_p9 = pnand %p549_p8, %p543_p5 }
  0x1b   :  { %454 = vmatmul.mubr.msk.f32.gmra.mxu0 %vm51_vm0, %v628_v10 }
  0x1d   :  { %460 = vmatmul.mubr.msk.f32.gmra.mxu1 %vm51_vm0, %v636_v11 }
  0xd7   :  { %v452_v13 = vpop.f32.mrf.mxu0 }
  0xd8   :  { %v148_v14 = vadd.f32 %v452_v13, %v420_v12 }
  0xd9   :  { %v142_v15 = vpop.f32.mrf.mxu0  ;;  %v458_v16 = vpop.f32.mrf.mxu1 }
  0xda   :  { %474 = vtanh.f32 %v148_v14  ;;  %v143_v17 = vadd.f32 %v420_v12, %v142_v15  ;;  %v168_v23 = vadd.f32 %v458_v16, %v420_v12 }
  0xdb   :  { %v455_v18 = vpop.f32.mrf.mxu0  ;;  %v162_v19 = vpop.f32.mrf.mxu1 }
  0xdc   :  { %476 = vtanh.f32 %v143_v17  ;;  %v158_v20 = vadd.f32 %v455_v18, %v420_v12  ;;  %v163_v21 = vadd.f32 %v420_v12, %v162_v19 }
  0xdd   :  { %v152_v22 = vpop.f32.mrf.mxu0  ;;  %v461_v24 = vpop.f32.mrf.mxu1 }
  0xde   :  { %478 = vtanh.f32 %v158_v20  ;;  %v153_v25 = vadd.f32 %v420_v12, %v152_v22  ;;  %v178_v28 = vadd.f32 %v461_v24, %v420_v12 }
  0xdf   :  { %480 = vtanh.f32 %v163_v21  ;;  %v172_v26 = vpop.f32.mrf.mxu1 }
  0xe0   :  { %482 = vtanh.f32 %v153_v25  ;;  %v173_v27 = vadd.f32 %v420_v12, %v172_v26 }
  0xe1   :  { %484 = vtanh.f32 %v168_v23 }
  0xe2   :  { %486 = vtanh.f32 %v173_v27 }
  0xe3   :  { %488 = vtanh.f32 %v178_v28 }
  0xe7   :  { %v475_v30 = vpop.eup %474 }
  0xe8   :  { %v197_v31 = vmul.f32 %v475_v30, %v429_v29 }
  0xe9   :  { %v477_v32 = vpop.eup %476 }
  0xea   :  { %v208_v33 = vsel %vm204_vm1, %v197_v31, 0.0  ;;  %v196_v34 = vmul.f32 %v477_v32, %v429_v29 }
  0xeb   :  { %v479_v35 = vpop.eup %478  ;;  %209 = vadd.xlane.f32.xlu0 %v208_v33 }
  0xec   :  { %v481_v36 = vpop.eup %480  ;;  %v199_v37 = vmul.f32 %v479_v35, %v429_v29  ;;  %v205_v42 = vsel %vm204_vm1, %v196_v34, 0.0 }
  0xed   :  { %v483_v38 = vpop.eup %482  ;;  %v200_v39 = vmul.f32 %v481_v36, %v429_v29 }
  0xee   :  { %v485_v40 = vpop.eup %484  ;;  %v214_v41 = vsel %vm204_vm1, %v199_v37, 0.0  ;;  %v198_v43 = vmul.f32 %v483_v38, %v429_v29 }
  0xef   :  { %v487_v44 = vpop.eup %486  ;;  %215 = vadd.xlane.f32.xlu1 %v214_v41  ;;  %206 = vadd.xlane.f32.xlu0 %v205_v42  ;;  %v217_v45 = vsel %vm204_vm1, %v200_v39, 0.0  ;;  %v201_v48 = vmul.f32 %v485_v40, %v429_v29 }
  0xf0   :  { %v202_v46 = vmul.f32 %v487_v44, %v429_v29  ;;  %v211_v47 = vsel %vm204_vm1, %v198_v43, 0.0  ;;  %v489_v49 = vpop.eup %488 }
  0xf1   :  { %v220_v51 = vsel %vm204_vm1, %v201_v48, 0.0  ;;  %v203_v52 = vmul.f32 %v489_v49, %v429_v29 }
  0xf2   :  { %v223_v50 = vsel %vm204_vm1, %v202_v46, 0.0 }
  0xf3   :  { %212 = vadd.xlane.f32.xlu1 %v211_v47  ;;  %218 = vadd.xlane.f32.xlu0 %v217_v45  ;;  %v226_v53 = vsel %vm204_vm1, %v203_v52, 0.0 }
  0xf7   :  { %221 = vadd.xlane.f32.xlu1 %v220_v51  ;;  %224 = vadd.xlane.f32.xlu0 %v223_v50 }
  0xfb   :  { %227 = vadd.xlane.f32.xlu1 %v226_v53 }
 0x174   :  { %v210_v54 = vpop.xlane.xlu0 %209 }
 0x175   :  { %v231_v55 = vmul.f32 1.442695, %v210_v54 }
 0x177   :  { %490 = vpow2.f32 %v231_v55 }
 0x178   :  { %v216_v56 = vpop.xlane.xlu1 %215  ;;  %v207_v57 = vpop.xlane.xlu0 %206 }
 0x179   :  { %v235_v58 = vmul.f32 1.442695, %v216_v56  ;;  %v229_v59 = vmul.f32 1.442695, %v207_v57 }
 0x17b   :  { %492 = vpow2.f32 %v235_v58 }
 0x17c   :  { %494 = vpow2.f32 %v229_v59  ;;  %v213_v60 = vpop.xlane.xlu1 %212  ;;  %v219_v61 = vpop.xlane.xlu0 %218 }
 0x17d   :  { %v233_v62 = vmul.f32 1.442695, %v213_v60  ;;  %v237_v63 = vmul.f32 1.442695, %v219_v61 }
 0x17f   :  { %496 = vpow2.f32 %v233_v62 }
 0x180   :  { %498 = vpow2.f32 %v237_v63  ;;  %v222_v0 = vpop.xlane.xlu1 %221  ;;  %v225_v1 = vpop.xlane.xlu0 %224 }
 0x181   :  { %v239_v3 = vmul.f32 1.442695, %v222_v0  ;;  %v241_v4 = vmul.f32 1.442695, %v225_v1 }
 0x183   :  { %500 = vpow2.f32 %v239_v3 }
 0x184   :  { %v656_v12 = vpop.eup %490  ;;  %502 = vpow2.f32 %v241_v4  ;;  %v228_v13 = vpop.xlane.xlu1 %227 }
 0x185   :  { %v251_v14 = vrot.slane %v656_v12, 4  ;;  %v243_v15 = vmul.f32 1.442695, %v228_v13 }
 0x187   :  { %v252_v16 = vadd.f32 %v656_v12, %v251_v14  ;;  %504 = vpow2.f32 %v243_v15 }
 0x188   :  { %v660_v17 = vpop.eup %492 }
 0x189   :  { %v662_v18 = vpop.eup %494  ;;  %v253_v19 = vrot.slane %v252_v16, 2  ;;  %v263_v20 = vrot.slane %v660_v17, 4 }
 0x18a   :  { %v245_v21 = vrot.slane %v662_v18, 4 }
 0x18b   :  { %v254_v22 = vadd.f32 %v253_v19, %v252_v16  ;;  %v264_v23 = vadd.f32 %v660_v17, %v263_v20 }
 0x18c   :  { %v667_v24 = vpop.eup %496  ;;  %v246_v25 = vadd.f32 %v662_v18, %v245_v21 }
 0x18d   :  { %v670_v26 = vpop.eup %498  ;;  %v255_v27 = vrot.slane %v254_v22, 1  ;;  %v265_v28 = vrot.slane %v264_v23, 2  ;;  %v257_v29 = vrot.slane %v667_v24, 4 }
 0x18e   :  { %v247_v30 = vrot.slane %v246_v25, 2  ;;  %v269_v31 = vrot.slane %v670_v26, 4 }
 0x18f   :  { %v256_v32 = vadd.f32 %v255_v27, %v254_v22  ;;  %v266_v33 = vadd.f32 %v265_v28, %v264_v23  ;;  %v258_v34 = vadd.f32 %v667_v24, %v257_v29 }
 0x190   :  { %v675_v35 = vpop.eup %500  ;;  %v248_v36 = vadd.f32 %v247_v30, %v246_v25  ;;  %v270_v37 = vadd.f32 %v670_v26, %v269_v31 }
 0x191   :  { %v678_v38 = vpop.eup %502  ;;  %v294_v39 = vadd.f32 1e-08, %v256_v32  ;;  %v267_v40 = vrot.slane %v266_v33, 1  ;;  %v259_v41 = vrot.slane %v258_v34, 2  ;;  %v275_v42 = vrot.slane %v675_v35, 4 }
 0x192   :  { %v249_v43 = vrot.slane %v248_v36, 1  ;;  %v271_v44 = vrot.slane %v270_v37, 2  ;;  %v281_v45 = vrot.slane %v678_v38, 4 }
 0x193   :  { %506 = vrcp.f32 %v294_v39  ;;  %v268_v46 = vadd.f32 %v267_v40, %v266_v33  ;;  %v260_v47 = vadd.f32 %v259_v41, %v258_v34  ;;  %v276_v48 = vadd.f32 %v675_v35, %v275_v42 }
 0x194   :  { %v683_v49 = vpop.eup %504  ;;  %v250_v50 = vadd.f32 %v249_v43, %v248_v36  ;;  %v272_v51 = vadd.f32 %v271_v44, %v270_v37  ;;  %v282_v52 = vadd.f32 %v678_v38, %v281_v45 }
 0x195   :  { %v296_v53 = vadd.f32 1e-08, %v268_v46  ;;  %v261_v54 = vrot.slane %v260_v47, 1  ;;  %v277_v55 = vrot.slane %v276_v48, 2  ;;  %v287_v56 = vrot.slane %v683_v49, 4 }
 0x196   :  { %v293_v57 = vadd.f32 1e-08, %v250_v50  ;;  %v273_v58 = vrot.slane %v272_v51, 1  ;;  %v283_v59 = vrot.slane %v282_v52, 2 }
 0x197   :  { %508 = vrcp.f32 %v296_v53  ;;  %v262_v60 = vadd.f32 %v261_v54, %v260_v47  ;;  %v278_v61 = vadd.f32 %v277_v55, %v276_v48  ;;  %v288_v62 = vadd.f32 %v683_v49, %v287_v56 }
 0x198   :  { %510 = vrcp.f32 %v293_v57  ;;  %v274_v63 = vadd.f32 %v273_v58, %v272_v51  ;;  %v284_v0 = vadd.f32 %v283_v59, %v282_v52 }
 0x199   :  { %v295_v1 = vadd.f32 1e-08, %v262_v60  ;;  %v279_v3 = vrot.slane %v278_v61, 1  ;;  %v289_v4 = vrot.slane %v288_v62, 2 }
 0x19a   :  { %v297_v13 = vadd.f32 1e-08, %v274_v63  ;;  %v285_v14 = vrot.slane %v284_v0, 1 }
 0x19b   :  { %512 = vrcp.f32 %v295_v1  ;;  %v280_v15 = vadd.f32 %v279_v3, %v278_v61  ;;  %v290_v16 = vadd.f32 %v289_v4, %v288_v62 }
 0x19c   :  { %514 = vrcp.f32 %v297_v13  ;;  %v286_v19 = vadd.f32 %v285_v14, %v284_v0 }
 0x19d   :  { %v291_v20 = vrot.slane %v290_v16, 1  ;;  %v298_v21 = vadd.f32 1e-08, %v280_v15 }
 0x19e   :  { %v299_v22 = vadd.f32 1e-08, %v286_v19 }
 0x19f   :  { %v292_v23 = vadd.f32 %v291_v20, %v290_v16  ;;  %516 = vrcp.f32 %v298_v21 }
 0x1a0   :  { %v507_v25 = vpop.eup %506  ;;  %518 = vrcp.f32 %v299_v22 }
 0x1a1   :  { %v300_v27 = vadd.f32 1e-08, %v292_v23  ;;  %v310_v28 = vmul.f32 %v507_v25, %v656_v12 }
 0x1a3   :  { %520 = vrcp.f32 %v300_v27  ;;  %v318_v29 = vmul.f32 %v310_v28, %v614_v5 }
 0x1a4   :  { %v509_v30 = vpop.eup %508 }
 0x1a5   :  { %v511_v31 = vpop.eup %510  ;;  %v312_v32 = vmul.f32 %v509_v30, %v660_v17  ;;  %v332_v33 = vsel %vm51_vm0, %v318_v29, 0.0 }
 0x1a6   :  { %v309_v34 = vmul.f32 %v511_v31, %v662_v18  ;;  %v333_v36 = vrot.slane %v332_v33, 4 }
 0x1a7   :  { %v320_v37 = vmul.f32 %v312_v32, %v628_v10 }
 0x1a8   :  { %v513_v39 = vpop.eup %512  ;;  %v317_v40 = vmul.f32 %v309_v34, %v604_v2  ;;  %v334_v41 = vadd.f32 %v333_v36, %v332_v33 }
 0x1a9   :  { %v515_v42 = vpop.eup %514  ;;  %v311_v12 = vmul.f32 %v513_v39, %v667_v24  ;;  %v346_v5 = vsel %vm51_vm0, %v320_v37, 0.0 }
 0x1aa   :  { %v313_v43 = vmul.f32 %v515_v42, %v670_v26  ;;  %v325_v17 = vsel %vm51_vm0, %v317_v40, 0.0  ;;  %v335_v44 = vrot.slane %v334_v41, 2  ;;  %v347_v45 = vrot.slane %v346_v5, 4 }
 0x1ab   :  { %v319_v18 = vmul.f32 %v311_v12, %v616_v6  ;;  %v326_v46 = vrot.slane %v325_v17, 4 }
 0x1ac   :  { %v517_v47 = vpop.eup %516  ;;  %v321_v10 = vmul.f32 %v313_v43, %v618_v7  ;;  %v348_v48 = vadd.f32 %v347_v45, %v346_v5  ;;  %v336_v26 = vadd.f32 %v335_v44, %v334_v41 }
 0x1ad   :  { %v519_v2 = vpop.eup %518  ;;  %v314_v50 = vmul.f32 %v517_v47, %v675_v35  ;;  %v327_v51 = vadd.f32 %v326_v46, %v325_v17  ;;  %v339_v24 = vsel %vm51_vm0, %v319_v18, 0.0 }
 0x1ae   :  { %v315_v52 = vmul.f32 %v519_v2, %v678_v38  ;;  %v340_v53 = vrot.slane %v339_v24, 4  ;;  %v349_v54 = vrot.slane %v348_v48, 2  ;;  %v353_v6 = vsel %vm51_vm0, %v321_v10, 0.0 }
 0x1af   :  { %v322_v55 = vmul.f32 %v314_v50, %v620_v8  ;;  %v328_v56 = vrot.slane %v327_v51, 2  ;;  %v354_v61 = vrot.slane %v353_v6, 4  ;;  %v337_v38 = vrot.slane %v336_v26, 1 }
 0x1b0   :  { %v521_v57 = vpop.eup %520  ;;  %v323_v7 = vmul.f32 %v315_v52, %v624_v9  ;;  %v341_v58 = vadd.f32 %v340_v53, %v339_v24  ;;  %v350_v59 = vadd.f32 %v349_v54, %v348_v48 }
 0x1b1   :  { %v316_v35 = vmul.f32 %v521_v57, %v683_v49  ;;  %v329_v60 = vadd.f32 %v328_v56, %v327_v51  ;;  %v360_v62 = vsel %vm51_vm0, %v322_v55, 0.0  ;;  %v355_v4 = vadd.f32 %v354_v61, %v353_v6 }
 0x1b2   :  { %v342_v63 = vrot.slane %v341_v58, 2  ;;  %v361_v0 = vrot.slane %v360_v62, 4  ;;  %v367_v1 = vsel %vm51_vm0, %v323_v7, 0.0  ;;  %v351_v9 = vrot.slane %v350_v59, 1 }
 0x1b3   :  { %v324_v8 = vmul.f32 %v316_v35, %v636_v11  ;;  %v330_v3 = vrot.slane %v329_v60, 1  ;;  %v368_v13 = vrot.slane %v367_v1, 4  ;;  %v356_v19 = vrot.slane %v355_v4, 2 }
 0x1b4   :  { %v343_v14 = vadd.f32 %v342_v63, %v341_v58  ;;  %v362_v15 = vadd.f32 %v361_v0, %v360_v62  ;;  %v338_v25 = vadd.f32 %v337_v38, %v336_v26  ;;  %v352_v31 = vadd.f32 %v351_v9, %v350_v59 }
 0x1b5   :  { %v331_v16 = vadd.f32 %v330_v3, %v329_v60  ;;  %v369_v49 = vadd.f32 %v368_v13, %v367_v1  ;;  %v374_v20 = vsel %vm51_vm0, %v324_v8, 0.0  ;;  %v357_v27 = vadd.f32 %v356_v19, %v355_v4 }
 0x1b6   :  { %v344_v21 = vrot.slane %v343_v14, 1  ;;  %v363_v22 = vrot.slane %v362_v15, 2  ;;  %v375_v23 = vrot.slane %v374_v20, 4 }
 0x1b7   :  { %v370_v28 = vrot.slane %v369_v49, 2  ;;  %v358_v32 = vrot.slane %v357_v27, 1  ;;  %v390_v34 = vsel %vm389_vm2, %v338_v25, %v331_v16 }
 0x1b8   :  { %v345_v11 = vadd.f32 %v344_v21, %v343_v14  ;;  %v364_v29 = vadd.f32 %v363_v22, %v362_v15  ;;  %v376_v30 = vadd.f32 %v375_v23, %v374_v20 }
 0x1b9   :  { %v371_v33 = vadd.f32 %v370_v28, %v369_v49  ;;  %v359_v40 = vadd.f32 %v358_v32, %v357_v27 }
 0x1ba   :  { %v365_v36 = vrot.slane %v364_v29, 1  ;;  %v377_v37 = vrot.slane %v376_v30, 2  ;;  %v392_v39 = vsel %vm391_vm3, %v345_v11, %v390_v34 }
 0x1bb   :  { %v372_v41 = vrot.slane %v371_v33, 1  ;;  %v394_v42 = vsel %vm393_vm4, %v352_v31, %v392_v39 }
 0x1bc   :  { %v366_v12 = vadd.f32 %v365_v36, %v364_v29  ;;  %v378_v5 = vadd.f32 %v377_v37, %v376_v30  ;;  %v396_v17 = vsel %vm395_vm5, %v359_v40, %v394_v42 }
 0x1bd   :  { %v373_v43 = vadd.f32 %v372_v41, %v371_v33 }
 0x1be   :  { %v379_v44 = vrot.slane %v378_v5, 1  ;;  %v398_v45 = vsel %vm397_vm6, %v366_v12, %v396_v17 }
 0x1bf   :  { %v400_v46 = vsel %vm399_vm7, %v373_v43, %v398_v45 }
 0x1c0   :  { %v380_v18 = vadd.f32 %v379_v44, %v378_v5 }
 0x1c2   :  { %v402_v47 = vsel %vm401_vm8, %v380_v18, %v400_v46 }
 0x1c3   :  { %404 = vst.msk [vmem:[#allocation5] sm:$0xff] %vm51_vm0, %v402_v47 }
 0x1c4   :  { %553 = shalt.err (!%p550_p9)
}
 0x1c5   :  { %414 = dma.vmem_to_hbm [thread:$0]  %s412_s5, 128, %s720_s4, [#allocation4]  }
 0x1c6   :  { %564 = dma.done.wait [#allocation4], 128  }
 0x1c7   :  { %565 = vsyncadd [#allocation4], 4294967168 }
 0x1c8   :  { %418 = vsyncpa [#allocation3], 1 }
 0x1c9   :  { %419 = vsyncpa [#allocation4], 1 }

</bundles_post_ra>
